<compile_context>
chip_gen: v7x
topology: tpu7x:2x2x1
jax: 0.10.0
libtpu: 0.0.40
codegen_flags: <defaults>
</compile_context>

<pallas_src>
import functools

import jax
import jax.numpy as jnp
from jax.experimental import pallas as pl
from jax.experimental.pallas import tpu as pltpu


def _round_up(x, m):
    return (x + m - 1) // m * m


def _hw_config():
    """(num_core_splits, physical VMEM bytes, is_v7x)."""
    kind = ""
    try:
        kind = jax.devices()[0].device_kind.lower()
    except Exception:
        pass
    is_v7 = ("v7" in kind) or ("tpu7" in kind)
    vmem_phys = (64 << 20) if is_v7 else (128 << 20)
    try:
        vmem_phys = int(pltpu.get_tpu_info().vmem_capacity_bytes)
    except Exception:
        pass
    num_splits = 2 if is_v7 else 1   # one batch shard per TensorCore on v7x
    return num_splits, vmem_phys, is_v7


def _bootstrap_sums_kernel(out_ref, tgt_ref, *rest, tn, compute_soft):
    if compute_soft:
        ce_out_ref, soft_out_ref, ce_acc, soft_acc = rest
    else:
        ce_out_ref, ce_acc = rest

    i = pl.program_id(1)
    last = pl.num_programs(1) - 1

    @pl.when(i == 0)
    def _():
        ce_acc[...] = jnp.zeros_like(ce_acc)
        if compute_soft:
            soft_acc[...] = jnp.zeros_like(soft_acc)

    x = out_ref[...].astype(jnp.float32)      # (tn, C) logits tile
    t = tgt_ref[...].astype(jnp.float32)      # (tn, C) soft-target tile

    # Numerically stable softmax normalizer; one EUP exp per element.
    m = jnp.max(x, axis=1, keepdims=True)     # XLU lane reduce
    z = x - m                                 # VPU
    e = jnp.exp(z)                            # EUP
    s = jnp.sum(e, axis=1, keepdims=True)     # XLU lane reduce
    log_s = jnp.log(s)                        # per-row EUP
    neg_log_sm = log_s - z                    # -log_softmax, one VPU op

    # CE term: fold rows into an (8, C) accumulator with pure VPU adds.  No row
    # mask needed: padded targets are zero, so padded rows contribute 0 here.
    ce_acc[...] += (neg_log_sm * t).reshape(tn // 8, 8, -1).sum(axis=0)

    if compute_soft:
        # sum_c(-log_softmax * softmax) per row == log(s) - sum_c(z * e) / s.
        # One extra VPU multiply + one XLU lane reduce per element; the rest is
        # per-row (tn, 1) work.  Padded rows contribute exactly log(C) each,
        # corrected analytically in the epilogue.
        ze_sum = jnp.sum(z * e, axis=1, keepdims=True)     # XLU lane reduce
        soft_row = log_s - ze_sum / s                      # (tn, 1)
        soft_acc[...] += soft_row.reshape(tn // 8, 8, 1).sum(axis=0)

    @pl.when(i == last)
    def _():
        ce_out_ref[...] = jnp.sum(ce_acc[...]).reshape(1, 1)
        if compute_soft:
            soft_out_ref[...] = jnp.sum(soft_acc[...]).reshape(1, 1)


def _bootstrap_sums(outputs, targets, *, compute_soft):
    """Returns (sum(-log_softmax*targets), sum(-log_softmax*softmax) or None)."""
    N, C = outputs.shape
    assert targets.shape == (N, C)

    num_splits, vmem_phys, is_v7 = _hw_config()
    itemsize = jnp.dtype(outputs.dtype).itemsize
    min_tile = 8 if itemsize >= 4 else 16        # sublane packing: f32 vs bf16

    # Per-generation VMEM budgets: v7x has 64 MiB/TC (keep double-buffered
    # inputs ~20 MiB, limit ~40 MiB); v5e/v6e have 128 MiB (big row strips keep
    # the ~0.35us per-step overhead negligible even for vocab-scale C).
    input_budget = (20 << 20) if is_v7 else (64 << 20)
    input_budget = min(input_budget, vmem_phys // 2)

    # Largest batch tile such that 2 inputs x 2 pipeline buffers fit the budget.
    tn = max(min_tile, input_budget // (4 * C * itemsize))
    tn = min(tn, 8192)
    tn = min(tn, _round_up(pl.cdiv(N, num_splits), min_tile))
    tn = max(min_tile, (tn // min_tile) * min_tile)

    rows_per_split = _round_up(pl.cdiv(N, num_splits), tn)
    tiles_per_split = rows_per_split // tn
    n_padded = num_splits * rows_per_split
    n_pad = n_padded - N

    if n_pad:
        outputs = jnp.pad(outputs, ((0, n_pad), (0, 0)))
        targets = jnp.pad(targets, ((0, n_pad), (0, 0)))

    resident = 4 * tn * C * itemsize + 2 * 8 * C * 4 + (1 << 20)
    vmem_limit = (40 << 20) if is_v7 else (100 << 20)
    vmem_limit = min(vmem_limit, vmem_phys - (8 << 20))
    vmem_limit = max(vmem_limit, resident + (4 << 20))

    kernel = functools.partial(
        _bootstrap_sums_kernel, tn=tn, compute_soft=compute_soft)

    out_shape = [jax.ShapeDtypeStruct((num_splits, 1), jnp.float32)]
    out_specs = [pl.BlockSpec((1, 1), lambda c, i: (c, 0))]
    scratch_shapes = [pltpu.VMEM((8, C), jnp.float32)]
    if compute_soft:
        out_shape.append(jax.ShapeDtypeStruct((num_splits, 1), jnp.float32))
        out_specs.append(pl.BlockSpec((1, 1), lambda c, i: (c, 0)))
        scratch_shapes.append(pltpu.VMEM((8, 1), jnp.float32))

    if num_splits > 1:
        dims = (pltpu.CORE_PARALLEL, pltpu.ARBITRARY)   # pin shards to v7x TCs
    else:
        dims = (pltpu.ARBITRARY, pltpu.ARBITRARY)

    cost = pl.CostEstimate(
        flops=(8 if compute_soft else 6) * n_padded * C,
        transcendentals=n_padded * C + 2 * n_padded,
        bytes_accessed=2 * n_padded * C * itemsize + 8 * num_splits)

    results = pl.pallas_call(
        kernel,
        out_shape=tuple(out_shape),
        grid_spec=pltpu.PrefetchScalarGridSpec(
            num_scalar_prefetch=0,
            grid=(num_splits, tiles_per_split),
            in_specs=[
                pl.BlockSpec((tn, C), lambda c, i: (c * tiles_per_split + i, 0)),
                pl.BlockSpec((tn, C), lambda c, i: (c * tiles_per_split + i, 0)),
            ],
            out_specs=out_specs,
            scratch_shapes=scratch_shapes,
        ),
        compiler_params=pltpu.CompilerParams(
            dimension_semantics=dims,
            vmem_limit_bytes=int(vmem_limit),
        ),
        cost_estimate=cost,
    )(outputs, targets)

    if compute_soft:
        ce_parts, soft_parts = results
        soft_sum = jnp.sum(soft_parts)
        if n_pad:
            # Each all-zero padded row contributes exactly log(C) to the soft
            # term (uniform softmax); subtract it instead of masking per step.
            soft_sum = soft_sum - jnp.float32(n_pad) * jnp.log(jnp.float32(C))
        return jnp.sum(ce_parts), soft_sum
    (ce_parts,) = results
    return jnp.sum(ce_parts), None


def soft_bootstrapping_loss(outputs, targets, epoch, *, beta, checkpoint):
    """Mirrors SoftBootstrapping.forward(outputs, targets, epoch)."""
    N = outputs.shape[0]
    compute_soft = bool(epoch >= checkpoint)   # static Python decision, as in the module
    ce_sum, soft_sum = _bootstrap_sums(outputs, targets, compute_soft=compute_soft)
    loss_ce = ce_sum / N
    if not compute_soft:
        return loss_ce
    loss_soft = soft_sum / N
    return beta * loss_ce + (1.0 - beta) * loss_soft


def _reference_loss(outputs, targets, epoch, *, beta, checkpoint):
    log_sm = jax.nn.log_softmax(outputs.astype(jnp.float32), axis=1)
    N = outputs.shape[0]
    loss_ce = -(log_sm * targets.astype(jnp.float32)).sum() / N
    preds = jax.nn.softmax(outputs.astype(jnp.float32), axis=1)
    loss_soft = -(log_sm * preds).sum() / N
    if epoch < checkpoint:
        return loss_ce
    return beta * loss_ce + (1.0 - beta) * loss_soft


if __name__ == "__main__":
    key = jax.random.PRNGKey(0)
    k_out, k_tgt = jax.random.split(key)

    # Small shapes; batch deliberately NOT tile-aligned to exercise padding
    # plus the analytic pad-row correction.
    N, C = 13, 128
    outputs = jax.random.normal(k_out, (N, C), dtype=jnp.float32)
    targets = jax.nn.softmax(
        jax.random.normal(k_tgt, (N, C), dtype=jnp.float32) * 2.0, axis=1)

    beta, checkpoint = 0.8, 5

    # Branch 1: epoch < checkpoint -> plain label cross entropy (soft term skipped,
    # second output and soft scratch are dropped from the pallas_call).
    loss_early = soft_bootstrapping_loss(outputs, targets, epoch=2,
                                         beta=beta, checkpoint=checkpoint)
    # Branch 2: epoch >= checkpoint -> bootstrapped blend.
    loss_late = soft_bootstrapping_loss(outputs, targets, epoch=7,
                                        beta=beta, checkpoint=checkpoint)
    # bf16 inputs (halved HBM traffic); kernel still accumulates in f32.
    out_bf16 = outputs.astype(jnp.bfloat16)
    tgt_bf16 = targets.astype(jnp.bfloat16)
    loss_bf16 = soft_bootstrapping_loss(out_bf16, tgt_bf16, epoch=7,
                                        beta=beta, checkpoint=checkpoint)
    jax.block_until_ready((loss_early, loss_late, loss_bf16))

    ref_early = _reference_loss(outputs, targets, 2, beta=beta, checkpoint=checkpoint)
    ref_late = _reference_loss(outputs, targets, 7, beta=beta, checkpoint=checkpoint)
    ref_bf16 = _reference_loss(out_bf16.astype(jnp.float32),
                               tgt_bf16.astype(jnp.float32), 7,
                               beta=beta, checkpoint=checkpoint)

    assert jnp.allclose(loss_early, ref_early, rtol=1e-5, atol=1e-5), (loss_early, ref_early)
    assert jnp.allclose(loss_late, ref_late, rtol=1e-5, atol=1e-5), (loss_late, ref_late)
    assert jnp.allclose(loss_bf16, ref_bf16, rtol=1e-4, atol=1e-4), (loss_bf16, ref_bf16)

    print("KERNEL_OK")
</pallas_src>

<mosaic_0001>
module attributes {stable_mosaic.version = 11 : i64} {
  func.func @_bootstrap_sums_kernel(%arg0: i32, %arg1: i32, %arg2: memref<16x128xf32, #tpu.memory_space<vmem>>, %arg3: memref<16x128xf32, #tpu.memory_space<vmem>>, %arg4: memref<1x1xf32, #tpu.memory_space<vmem>>, %arg5: memref<8x128xf32, #tpu.memory_space<vmem>>) attributes {dimension_semantics = [#tpu.dimension_semantics<arbitrary>, #tpu.dimension_semantics<arbitrary>], iteration_bounds = array<i64: 1, 1>, scalar_prefetch = 0 : i64, scratch_operands = 1 : i64, tpu.core_type = #tpu.core_type<tc>, window_params = [{transform_indices = @transform_0, window_bounds = array<i64: 16, 128>}, {transform_indices = @transform_1, window_bounds = array<i64: 16, 128>}, {transform_indices = @transform_2, window_bounds = array<i64: 1, 1>}]} {
    %c0_i32 = arith.constant 0 : i32
    %0 = arith.cmpi eq, %arg1, %c0_i32 : i32
    %1 = arith.extui %0 : i1 to i32
    %c0_i32_0 = arith.constant 0 : i32
    %2 = arith.cmpi ne, %1, %c0_i32_0 : i32
    scf.if %2 {
      %cst_12 = arith.constant 0.000000e+00 : f32
      %24 = vector.broadcast %cst_12 : f32 to vector<8x128xf32>
      %c0_13 = arith.constant 0 : index
      %c0_14 = arith.constant 0 : index
      %25 = vector.load %arg5[%c0_13, %c0_14] : memref<8x128xf32, #tpu.memory_space<vmem>>, vector<8x128xf32>
      tpu.vector_store %arg5[%c0_13, %c0_14], %24 {strides = array<i32>} : memref<8x128xf32, #tpu.memory_space<vmem>>, vector<8x128xf32>,
    } else {
    }
    %c0 = arith.constant 0 : index
    %c0_1 = arith.constant 0 : index
    %3 = vector.load %arg2[%c0, %c0_1] : memref<16x128xf32, #tpu.memory_space<vmem>>, vector<16x128xf32>
    %c0_2 = arith.constant 0 : index
    %c0_3 = arith.constant 0 : index
    %4 = vector.load %arg3[%c0_2, %c0_3] : memref<16x128xf32, #tpu.memory_space<vmem>>, vector<16x128xf32>
    %cst = arith.constant dense<0xFF800000> : vector<16xf32>
    %5 = vector.multi_reduction <maximumf>, %3, %cst [1] : vector<16x128xf32> to vector<16xf32>
    %6 = vector.shape_cast %5 : vector<16xf32> to vector<16x1xf32>
    %7 = vector.broadcast %6 : vector<16x1xf32> to vector<16x128xf32>
    %8 = arith.subf %3, %7 : vector<16x128xf32>
    %9 = math.exp %8 : vector<16x128xf32>
    %cst_4 = arith.constant dense<0.000000e+00> : vector<16xf32>
    %10 = vector.multi_reduction <add>, %9, %cst_4 [1] : vector<16x128xf32> to vector<16xf32>
    %11 = vector.shape_cast %10 : vector<16xf32> to vector<16x1xf32>
    %12 = math.log %11 : vector<16x1xf32>
    %13 = vector.broadcast %12 : vector<16x1xf32> to vector<16x128xf32>
    %14 = arith.subf %13, %8 : vector<16x128xf32>
    %c0_5 = arith.constant 0 : index
    %c0_6 = arith.constant 0 : index
    %15 = vector.load %arg5[%c0_5, %c0_6] : memref<8x128xf32, #tpu.memory_space<vmem>>, vector<8x128xf32>
    %16 = arith.mulf %14, %4 : vector<16x128xf32>
    %17 = vector.shape_cast %16 : vector<16x128xf32> to vector<2x8x128xf32>
    %cst_7 = arith.constant dense<0.000000e+00> : vector<8x128xf32>
    %18 = vector.multi_reduction <add>, %17, %cst_7 [0] : vector<2x8x128xf32> to vector<8x128xf32>
    %19 = arith.addf %15, %18 : vector<8x128xf32>
    %c0_8 = arith.constant 0 : index
    %c0_9 = arith.constant 0 : index
    %20 = vector.load %arg5[%c0_8, %c0_9] : memref<8x128xf32, #tpu.memory_space<vmem>>, vector<8x128xf32>
    tpu.vector_store %arg5[%c0_8, %c0_9], %19 {strides = array<i32>} : memref<8x128xf32, #tpu.memory_space<vmem>>, vector<8x128xf32>,
    %c0_i32_10 = arith.constant 0 : i32
    %21 = arith.cmpi eq, %arg1, %c0_i32_10 : i32
    %22 = arith.extui %21 : i1 to i32
    %c0_i32_11 = arith.constant 0 : i32
    %23 = arith.cmpi ne, %22, %c0_i32_11 : i32
    scf.if %23 {
      %c0_12 = arith.constant 0 : index
      %c0_13 = arith.constant 0 : index
      %24 = vector.load %arg5[%c0_12, %c0_13] : memref<8x128xf32, #tpu.memory_space<vmem>>, vector<8x128xf32>
      %25 = vector.shape_cast %24 : vector<8x128xf32> to vector<1x8x128xf32>
      %cst_14 = arith.constant dense<0.000000e+00> : vector<1xf32>
      %26 = vector.multi_reduction <add>, %25, %cst_14 [1, 2] : vector<1x8x128xf32> to vector<1xf32>
      %27 = vector.shape_cast %26 : vector<1xf32> to vector<1x1x1xf32>
      %28 = vector.extract %27[0, 0, 0] : f32 from vector<1x1x1xf32>
      %29 = vector.broadcast %28 : f32 to vector<1x1xf32>
      %c0_15 = arith.constant 0 : index
      %c0_16 = arith.constant 0 : index
      %30 = vector.load %arg4[%c0_15, %c0_16] : memref<1x1xf32, #tpu.memory_space<vmem>>, vector<1x1xf32>
      tpu.vector_store %arg4[%c0_15, %c0_16], %29 {strides = array<i32>} : memref<1x1xf32, #tpu.memory_space<vmem>>, vector<1x1xf32>,
    } else {
    }
    return
  }
  func.func @transform_0(%arg0: i32, %arg1: i32) -> (i32, i32) {
    %c1_i32 = arith.constant 1 : i32
    %0 = arith.muli %arg0, %c1_i32 : i32
    %1 = arith.addi %0, %arg1 : i32
    %c0_i32 = arith.constant 0 : i32
    %c0_i32_0 = arith.constant 0 : i32
    return %1, %c0_i32 : i32, i32
  }
  func.func @transform_1(%arg0: i32, %arg1: i32) -> (i32, i32) {
    %c1_i32 = arith.constant 1 : i32
    %0 = arith.muli %arg0, %c1_i32 : i32
    %1 = arith.addi %0, %arg1 : i32
    %c0_i32 = arith.constant 0 : i32
    %c0_i32_0 = arith.constant 0 : i32
    return %1, %c0_i32 : i32, i32
  }
  func.func @transform_2(%arg0: i32, %arg1: i32) -> (i32, i32) {
    %c0_i32 = arith.constant 0 : i32
    %c0_i32_0 = arith.constant 0 : i32
    return %arg0, %c0_i32 : i32, i32
  }
}

</mosaic_0001>

<bundles_post_ra>
// kernel: tpu_custom_call.1
= control target key start
LH: loop header
LB: loop body
LE: loop exit
PB: predicated region body
PF: predicated region fallthrough
CT: control target
= control target key end

     0   :  { %7 = vsyncpa [#allocation4], 0  ;;  %s262_s0 = inlined_call_operand.hbm [shape: f32[16,128], index: 0, kind: input, shape index: {}]   ;;  %s263_s1 = inlined_call_operand.hbm [shape: f32[16,128], index: 1, kind: input, shape index: {}]   ;;  %s264_s2 = inlined_call_operand.hbm [shape: f32[1,1], index: 2, kind: output, shape index: {}]  }
   0x1   :  { %8 = vsyncpa [#allocation7], 0 }
   0x2   :  { %9 = vsyncpa [#allocation5], 0  ;;  %s206_s9 = smov [#allocation3]   ;;  %s134_s13 = scalar_lea.hbm %s262_s0, 256 }
   0x3   :  { %s19_s10 = sshll.u32 %s206_s9, 4  ;;  %p135_p0 = scmp.ne.s32.totalorder %s262_s0, %s134_s13  ;;  %s20_s10 = int_to_ptr.vmem [resolvable:$true] %s19_s10 }
   0x4   :  { %p138_p1 = scmp.lt.u32.totalorder %s134_s13, %s262_s0 }
   0x6   :  { %p140_p2 = pnand %p138_p1, %p135_p0 }
   0x8   :  { %143 = shalt.err (!%p140_p2)
}
   0x9   :  { %s144_s18 = scalar_lea.vmem %s20_s10, 256  ;;  %p149_p4 = scmp.lt.s32.totalorder %s20_s10, %s20_s10 }
   0xa   :  { %p145_p3 = scmp.ne.s32.totalorder %s20_s10, %s144_s18  ;;  %p150_p5 = scmp.lt.s32.totalorder %s144_s18, %s144_s18 }
   0xc   :  { %p151_p6 = por %p150_p5, %p149_p4 }
   0xe   :  { %p152_p7 = pnand %p151_p6, %p145_p3 }
  0x10   :  { %155 = shalt.err (!%p152_p7)
}
  0x11   :  { %s207_s19 = smov 128   ;;  %s208_s20 = smov 8  }
  0x12   :  { %25 = dma.hbm_to_vmem [thread:$0]  %s262_s0, 256, %s20_s10, [#allocation4], %s207_s19, %s207_s19, %s208_s20  }
  0x13   :  { %s209_s23 = smov [#allocation6]   ;;  %s156_s27 = scalar_lea.hbm %s263_s1, 256 }
  0x14   :  { %s35_s24 = sshll.u32 %s209_s23, 4  ;;  %p157_p8 = scmp.ne.s32.totalorder %s263_s1, %s156_s27  ;;  %s36_s24 = int_to_ptr.vmem [resolvable:$true] %s35_s24 }
  0x15   :  { %p160_p9 = scmp.lt.u32.totalorder %s156_s27, %s263_s1 }
  0x17   :  { %p162_p10 = pnand %p160_p9, %p157_p8 }
  0x19   :  { %165 = shalt.err (!%p162_p10)
}
  0x1a   :  { %s166_s4 = scalar_lea.vmem %s36_s24, 256  ;;  %p171_p12 = scmp.lt.s32.totalorder %s36_s24, %s36_s24 }
  0x1b   :  { %p167_p11 = scmp.ne.s32.totalorder %s36_s24, %s166_s4  ;;  %p172_p13 = scmp.lt.s32.totalorder %s166_s4, %s166_s4 }
  0x1d   :  { %p173_p0 = por %p172_p13, %p171_p12 }
  0x1f   :  { %p174_p1 = pnand %p173_p0, %p167_p11 }
  0x21   :  { %177 = shalt.err (!%p174_p1)
}
  0x22   :  { %41 = dma.hbm_to_vmem [thread:$0]  %s263_s1, 256, %s36_s24, [#allocation7], %s207_s19, %s207_s19, %s208_s20  }
  0x23   :  { %200 = dma.done.wait [#allocation4], 256  }
  0x24   :  { %201 = vsyncadd [#allocation4], 4294967040 }
  0x25   :  { %202 = dma.done.wait [#allocation7], 256  }
  0x26   :  { %203 = vsyncadd [#allocation7], 4294967040  ;;  %v57_v0 = vld [vmem:[#allocation3] sm:$0xff]  ;;  %v58_v1 = vld [vmem:[#allocation3 + $0x8] sm:$0xff]  ;;  %s210_s1 = smov [#allocation8]   ;;  %vm101_vm0 = vcmask 0  }
  0x27   :  { %61 = vmax.xlane.f32.xlu0 %v57_v0  ;;  %v59_v17 = vld [vmem:[#allocation6] sm:$0xff]  ;;  %v60_v18 = vld [vmem:[#allocation6 + $0x8] sm:$0xff]  ;;  %s109_s6 = sshll.u32 %s210_s1, 4  ;;  %s110_s6 = int_to_ptr.vmem [resolvable:$true] %s109_s6 }
  0x28   :  { %s178_s8 = scalar_lea.vmem %s110_s6, 16  ;;  %s182_s9 = scalar_lea.vmem %s110_s6, 32 }
  0x29   :  { %p179_p2 = scmp.ne.s32.totalorder %s110_s6, %s178_s8  ;;  %p183_p3 = scmp.lt.s32.totalorder %s110_s6, %s110_s6 }
  0x2a   :  { %p184_p4 = scmp.lt.s32.totalorder %s182_s9, %s178_s8 }
  0x2b   :  { %63 = vmax.xlane.f32.xlu0 %v58_v1 }
  0x2c   :  { %p185_p5 = por %p184_p4, %p183_p3 }
  0x2e   :  { %p186_p6 = pnand %p185_p5, %p179_p2 }
  0xb4   :  { %v62_v2 = vpop.xlane.xlu0 %61 }
  0xb5   :  { %v65_v3 = vsub.f32 %v57_v0, %v62_v2 }
  0xb7   :  { %v67_v4 = vmul.f32 1.442695, %v65_v3 }
  0xb8   :  { %v64_v5 = vpop.xlane.xlu0 %63 }
  0xb9   :  { %v66_v6 = vsub.f32 %v58_v1, %v64_v5  ;;  %126 = vpow2.f32 %v67_v4 }
  0xbb   :  { %v69_v7 = vmul.f32 1.442695, %v66_v6 }
  0xbd   :  { %128 = vpow2.f32 %v69_v7 }
  0xc3   :  { %v127_v8 = vpop.eup %126 }
  0xc4   :  { %71 = vadd.xlane.f32.xlu1 %v127_v8 }
  0xc7   :  { %v129_v9 = vpop.eup %128 }
  0xc8   :  { %73 = vadd.xlane.f32.xlu1 %v129_v9 }
 0x151   :  { %v72_v10 = vpop.xlane.xlu1 %71 }
 0x152   :  { %130 = vlog2.f32 %v72_v10 }
 0x155   :  { %v74_v11 = vpop.xlane.xlu1 %73 }
 0x156   :  { %132 = vlog2.f32 %v74_v11 }
 0x15c   :  { %v131_v12 = vpop.eup %130 }
 0x15d   :  { %v76_v13 = vmul.f32 0.6931472, %v131_v12 }
 0x15f   :  { %v79_v15 = vsub.f32 %v76_v13, %v65_v3 }
 0x160   :  { %v133_v14 = vpop.eup %132 }
 0x161   :  { %v78_v16 = vmul.f32 0.6931472, %v133_v14  ;;  %v82_v20 = vmul.f32 %v79_v15, %v59_v17 }
 0x163   :  { %v80_v19 = vsub.f32 %v78_v16, %v66_v6 }
 0x165   :  { %v83_v21 = vmul.f32 %v80_v19, %v60_v18 }
 0x167   :  { %v84_v22 = vadd.f32 %v83_v21, %v82_v20 }
 0x169   :  { %91 = vadd.xlane.f32.xlu0 %v84_v22 }
 0x1f6   :  { %v92_v23 = vpop.xlane.xlu0 %91 }
 0x1f7   :  { %v93_v24 = vrot.slane %v92_v23, 4 }
 0x1f9   :  { %v94_v25 = vadd.f32 %v93_v24, %v92_v23 }
 0x1fb   :  { %v95_v26 = vrot.slane %v94_v25, 2 }
 0x1fd   :  { %v96_v27 = vadd.f32 %v95_v26, %v94_v25 }
 0x1ff   :  { %v97_v28 = vrot.slane %v96_v27, 1 }
 0x201   :  { %v98_v29 = vadd.f32 %v97_v28, %v96_v27 }
 0x203   :  { %119 = vpush %v98_v29 }
 0x234   :  { %s120_s7 = spop %119 }
 0x235   :  { %v100_v30 = vstv %s120_s7 }
 0x236   :  { %102 = vst.msk [vmem:[#allocation8] sm:$0x1] %vm101_vm0, %v100_v30 }
 0x237   :  { %189 = shalt.err (!%p186_p6)
}
 0x238   :  { %s190_s12 = scalar_lea.hbm %s264_s2, 16 }
 0x239   :  { %p191_p7 = scmp.ne.s32.totalorder %s264_s2, %s190_s12  ;;  %p194_p8 = scmp.lt.u32.totalorder %s190_s12, %s264_s2 }
 0x23b   :  { %p196_p9 = pnand %p194_p8, %p191_p7 }
 0x23d   :  { %199 = shalt.err (!%p196_p9)
}
 0x23e   :  { %112 = dma.vmem_to_hbm [thread:$0]  %s110_s6, 16, %s264_s2, [#allocation5]  }
 0x23f   :  { %204 = dma.done.wait [#allocation5], 16  }
 0x240   :  { %205 = vsyncadd [#allocation5], 4294967280 }
 0x241   :  { %116 = vsyncpa [#allocation4], 1 }
 0x242   :  { %117 = vsyncpa [#allocation7], 1 }
 0x243   :  { %118 = vsyncpa [#allocation5], 1 }

</bundles_post_ra>
